<compile_context>
chip_gen: v7x
topology: tpu7x:2x2x1
jax: 0.10.0
libtpu: 0.0.40
codegen_flags: <defaults>
</compile_context>

<pallas_src>
import jax
import jax.numpy as jnp
from jax.experimental import pallas as pl
from jax.experimental.pallas import tpu as pltpu


def _heaviside_kernel(x_ref, o_ref):
    x = x_ref[...]
    o_ref[...] = (x >= 0).astype(o_ref.dtype)


_LANE_CANDIDATES = (2048, 1024, 512, 256, 128)
_TARGET_BLOCK_BYTES = 2 * 1024 * 1024   # ~2 MiB/block; in+out dbl-buf ~ 8 MiB
_SMALL_N_BYPASS = 32 * 1024             # below this, pallas launch overhead dominates


def heaviside_forward(x):
    """Elementwise heaviside: (x >= 0) cast back to x.dtype."""
    orig_shape = x.shape
    dtype = x.dtype
    flat = x.reshape(-1)
    n = flat.shape[0]
    if n == 0:
        return x

    # Pick the widest lane-dense last dim that exactly divides n (no padding).
    lanes = None
    for w in _LANE_CANDIDATES:
        if n % w == 0:
            lanes = w
            break

    # Bypass Pallas for tiny tensors or ragged sizes: plain XLA elementwise is
    # already HBM-roofline-bound and avoids launch overhead / extra HBM passes.
    if n < _SMALL_N_BYPASS or lanes is None:
        return (x >= 0).astype(dtype)

    itemsize = jnp.dtype(dtype).itemsize
    # Sublane alignment per dtype: f32 -> 8, bf16 -> 16, int8 -> 32.
    sub = max(8, 32 // max(int(itemsize), 1))

    rows = n // lanes
    x2d = flat.reshape(rows, lanes)

    # ~2 MiB blocks.
    tile_rows = min(rows, max(sub, _TARGET_BLOCK_BYTES // (lanes * int(itemsize))))

    # v7x megacore: prefer >= 2 blocks so the "parallel" axis shards across
    # both TensorCores (bandwidth-bound => both TCs should be issuing DMAs).
    if rows >= 2 * sub:
        half_rows = (rows // 2) // sub * sub
        tile_rows = min(tile_rows, half_rows)

    # Blocks smaller than the full rows dim must obey the (sub, 128) rule.
    if tile_rows < rows:
        tile_rows = max(sub, (tile_rows // sub) * sub)

    grid = (pl.cdiv(rows, tile_rows),)

    out2d = pl.pallas_call(
        _heaviside_kernel,
        out_shape=jax.ShapeDtypeStruct((rows, lanes), dtype),
        grid_spec=pltpu.PrefetchScalarGridSpec(
            num_scalar_prefetch=0,
            grid=grid,
            in_specs=[pl.BlockSpec((tile_rows, lanes), lambda i: (i, 0))],
            out_specs=pl.BlockSpec((tile_rows, lanes), lambda i: (i, 0)),
        ),
        compiler_params=pltpu.CompilerParams(
            dimension_semantics=("parallel",),
        ),
    )(x2d)

    return out2d.reshape(orig_shape)


class Sigmoid:
    """JAX/Pallas mirror of the SpikeYOLO `Sigmoid` module (forward only).

    Forward is the heaviside spike; `alpha` is kept for interface parity and
    would only be used by the (unimplemented) surrogate backward.
    """

    def __init__(self, alpha=2):
        self.alpha = float(alpha)

    def __call__(self, inputs):
        return heaviside_forward(inputs)


if __name__ == "__main__":
    key = jax.random.PRNGKey(0)
    mod = Sigmoid(alpha=2)

    # Small NCHW feature map (module-consistent shape) -> small-input bypass.
    x_small = jax.random.normal(key, (2, 4, 16, 16), dtype=jnp.float32)
    y_small = jax.block_until_ready(mod(x_small))
    ref_small = (x_small >= 0).astype(x_small.dtype)
    assert y_small.shape == x_small.shape and y_small.dtype == x_small.dtype
    assert bool(jnp.all(y_small == ref_small))

    # Slightly larger map -> exercises the Pallas path (grid >= 2 blocks).
    key2 = jax.random.PRNGKey(0)
    x_big = jax.random.normal(key2, (2, 8, 64, 64), dtype=jnp.float32)
    x_big = x_big.at[0, 0, 0, 0].set(0.0)       # heaviside(0) == 1
    x_big = x_big.at[0, 0, 0, 1].set(-3.0)      # negative -> 0
    y_big = jax.block_until_ready(mod(x_big))
    ref_big = (x_big >= 0).astype(x_big.dtype)
    assert y_big.shape == x_big.shape and y_big.dtype == x_big.dtype
    assert bool(jnp.all(y_big == ref_big))

    print("KERNEL_OK")
</pallas_src>

<mosaic_0001>
module attributes {stable_mosaic.version = 11 : i64} {
  func.func @_heaviside_kernel(%arg0: i32, %arg1: memref<16x2048xf32, #tpu.memory_space<vmem>>, %arg2: memref<16x2048xf32, #tpu.memory_space<vmem>>) attributes {dimension_semantics = [#tpu.dimension_semantics<parallel>], iteration_bounds = array<i64: 2>, scalar_prefetch = 0 : i64, scratch_operands = 0 : i64, tpu.core_type = #tpu.core_type<tc>, window_params = [{transform_indices = @transform_0, window_bounds = array<i64: 16, 2048>}, {transform_indices = @transform_1, window_bounds = array<i64: 16, 2048>}]} {
    %c0 = arith.constant 0 : index
    %c0_0 = arith.constant 0 : index
    %0 = vector.load %arg1[%c0, %c0_0] : memref<16x2048xf32, #tpu.memory_space<vmem>>, vector<16x2048xf32>
    %cst = arith.constant 0.000000e+00 : f32
    %1 = vector.broadcast %cst : f32 to vector<16x2048xf32>
    %2 = arith.cmpf oge, %0, %1 : vector<16x2048xf32>
    %3 = arith.extui %2 : vector<16x2048xi1> to vector<16x2048xi32>
    %4 = arith.sitofp %3 : vector<16x2048xi32> to vector<16x2048xf32>
    %c0_1 = arith.constant 0 : index
    %c0_2 = arith.constant 0 : index
    %5 = vector.load %arg2[%c0_1, %c0_2] : memref<16x2048xf32, #tpu.memory_space<vmem>>, vector<16x2048xf32>
    tpu.vector_store %arg2[%c0_1, %c0_2], %4 {strides = array<i32>} : memref<16x2048xf32, #tpu.memory_space<vmem>>, vector<16x2048xf32>,
    return
  }
  func.func @transform_0(%arg0: i32) -> (i32, i32) {
    %c0_i32 = arith.constant 0 : i32
    %c0_i32_0 = arith.constant 0 : i32
    return %arg0, %c0_i32 : i32, i32
  }
  func.func @transform_1(%arg0: i32) -> (i32, i32) {
    %c0_i32 = arith.constant 0 : i32
    %c0_i32_0 = arith.constant 0 : i32
    return %arg0, %c0_i32 : i32, i32
  }
}

</mosaic_0001>

<bundles_post_ra>
// kernel: tpu_custom_call.1
= control target key start
LH: loop header
LB: loop body
LE: loop exit
PB: predicated region body
PF: predicated region fallthrough
CT: control target
= control target key end

     0   :  { %6 = vsyncpa [#allocation3], 0  ;;  %s871_s0 = inlined_call_operand.hbm [shape: f32[32,2048], index: 0, kind: input, shape index: {}]   ;;  %s872_s1 = inlined_call_operand.hbm [shape: f32[32,2048], index: 1, kind: output, shape index: {}]  }
   0x1   :  { %8 = vsyncpa [#allocation3 + $0x1], 0 }
   0x2   :  { %9 = vsyncpa [#allocation4], 0 }
   0x3   :  { %11 = vsyncpa [#allocation4 + $0x1], 0  ;;  %s604_s6 = smov 0   ;;  %s606_s7 = smov 0  }
   0x4   :  { %s608_s8 = smov 0   ;;  %s610_s9 = smov 0  }
   0x5 LB: > { %s625_s10 = sadd.s32 4294967295, %s585_s9   ;;  %s386_s11 = sadd.s32 4294967294, %s585_s9   ;;  %s585_s9 = sphi %s610_s9, %s885_s9   ;;  %s581_s8 = sphi %s608_s8, %s884_s8   ;;  %s577_s7 = sphi %s606_s7, %s883_s7   ;;  %s573_s6 = sphi %s604_s6, %s882_s6  }
   0x6   : > { %s629_s12 = sadd.s32 1, %s585_s9   ;;  %s24_s13 = sadd.s32 1, %s581_s8 }
   0x7   : > { %s21_s14 = ssub.s32 %s585_s9, %s629_s12  ;;  %p31_p0 = scmp.ne.s32.totalorder %s581_s8, %s577_s7 }
   0x8   : > { %p22_p1 = scmp.eq.s32.totalorder %s21_s14, 0  ;;  %p32_p2 = scmp.eq.s32.totalorder %s585_s9, 0 }
   0x9   : > { %p37_p3 = scmp.ne.s32.totalorder %s577_s7, %s573_s6  ;;  %p38_p4 = scmp.eq.s32.totalorder %s625_s10, 0 }
   0xa   : > { %s641_s15 = scalar_select %p22_p1, %s581_s8, %s24_s13  }
   0xb   : > { %p643_p5 = por %p32_p2, %p31_p0  ;;  %p647_p6 = por %p38_p4, %p37_p3 }
   0xc   : > { %p61_p7 = scmp.eq.s32.totalorder %s625_s10, 1  ;;  %p67_p8 = scmp.eq.s32.totalorder %s386_s11, 1 }
   0xd   : > { %p450_p10 = scmp.lt.s32.totalorder %s585_s9, 2  ;;  %s87_s20 = sand.u32 1, %s581_s8  }
   0xe   : > { %p654_p11 = por %p61_p7, %p31_p0  ;;  %p658_p12 = por %p67_p8, %p37_p3 }
   0xf   : > { %s435_s21 = sshll.u32 %s585_s9, 12  ;;  %s389_s22 = sshll.u32 %s87_s20, 8 }
  0x10   : > { %s876_s18 = scalar_select %p654_p11, 1, 0 }
  0x11   : > { %s877_s19 = scalar_select %p658_p12, 1, 0 }
  0x12   : > { %s667_s25 = scalar_lea.hbm %s871_s0, %s435_s21  ;;  %s91_s26 = scalar_lea.vmem [#allocation2], %s389_s22 }
  0x13   : > { %s99_s27 = sshll.u32 %s91_s26, 4  ;;  %p671_p13 = pnand %p450_p10, %p643_p5  ;;  %s675_s27 = int_to_ptr.vmem [resolvable:$true] %s99_s27 }
  0x14   : > { %s677_s29 = scalar_lea.sflag [#allocation3], %s87_s20  ;;  %s489_s30 = scalar_lea.hbm %s667_s25, 4096 }
  0x15   : > { %p490_p0 = scmp.ne.s32.totalorder %s667_s25, %s489_s30  ;;  %p491_p1 = pneg %p671_p13 }
  0x16   : > { %s494_s4 = scalar_lea.hbm %s871_s0, 8192  ;;  %p495_p4 = scmp.lt.u32.totalorder %s667_s25, %s871_s0 }
  0x17   : > { %p492_p2 = pnand %p491_p1, %p490_p0  ;;  %p496_p5 = scmp.lt.u32.totalorder %s494_s4, %s489_s30 }
  0x18   : > { %p498_p8 = scmp.lt.u32.totalorder %s489_s30, %s667_s25 }
  0x19   : > { %p493_p3 = pneg %p492_p2  ;;  %p497_p7 = por %p496_p5, %p495_p4 }
  0x1b   : > { %p499_p10 = por %p498_p8, %p497_p7 }
  0x1d   : > { %p500_p9 = pnand %p499_p10, %p493_p3 }
  0x1f   : > { %503 = shalt.err (!%p500_p9)
}
  0x20   : > { %s504_s13 = scalar_lea.vmem %s675_s27, 4096  ;;  %s587_s14 = smov [#allocation2]  }
  0x21   : > { %p505_p0 = scmp.ne.s32.totalorder %s675_s27, %s504_s13  ;;  %s509_s16 = sshll.u32 %s587_s14, 4  ;;  %s510_s16 = int_to_ptr.vmem [resolvable:$false] %s509_s16 }
  0x22   : > { %s511_s20 = scalar_lea.vmem %s510_s16, 8192  ;;  %p512_p11 = scmp.lt.s32.totalorder %s675_s27, %s510_s16 }
  0x23   : > { %p507_p2 = pnand %p505_p0, %p491_p1  ;;  %p513_p4 = scmp.lt.s32.totalorder %s511_s20, %s504_s13 }
  0x25   : > { %p508_p12 = pneg %p507_p2  ;;  %p514_p5 = por %p513_p4, %p512_p11 }
  0x27   : > { %p515_p7 = pnand %p514_p5, %p508_p12 }
  0x29   : > { %518 = shalt.err (!%p515_p7)
}
  0x2a   : > { %s588_s21 = smov 2048   ;;  %s589_s22 = smov 128  }
  0x2b   : > { %445 = dma.hbm_to_vmem [thread:$0]  (!%p671_p13), %s667_s25, 4096, %s675_s27, %s677_s29, %s588_s21, %s588_s21, %s589_s22  }
  0x2c   : > { %p393_p9 = scmp.ge.s32.totalorder %s585_s9, 1  ;;  %p107_p1 = scmp.lt.s32.totalorder %s585_s9, 3 }
  0x2e   : > { %p108_p3 = pnand %p393_p9, %p107_p1 }
  0x2f   : > { %s708_s23 = sand.u32 (!%p108_p3), 1, %s577_s7  }
  0x30   : > { %111 = sbr.rel (%p108_p3) target bundleno = 102 (0x66), region = 24  ;;  %s394_s24 = sshll.u32 (!%p108_p3), %s708_s23, 8 }
  0x31   : > { %s114_s26 = scalar_lea.sflag (!%p108_p3), [#allocation3], %s708_s23  ;;  %s712_s30 = scalar_lea.vmem (!%p108_p3), [#allocation2], %s394_s24 }
  0x37   : > { %564 = dma.done.wait (%p647_p6), %s114_s26, 4096  }
  0x38   : > { %566 = vsyncadd (%p647_p6), %s114_s26, 4294963200  ;;  %v138_v0 = vld [vmem:[%s712_s30] sm:$0xff]  ;;  %v139_v1 = vld [vmem:[%s712_s30 + $0x8] sm:$0xff]  ;;  %s437_s25 = sshll.u32 %s625_s10, 12  ;;  %s722_s27 = scalar_lea.vmem [#allocation5], %s394_s24  ;;  %v590_v6 = vmov 0.0  }
  0x39   : > { %v140_v2 = vld [vmem:[%s712_s30 + $0x10] sm:$0xff]  ;;  %s313_s17 = sshll.u32 %s722_s27, 4  ;;  %vm170_vm0 = vcmp.ge.f32.partialorder %v138_v0, 0.0  ;;  %vm171_vm1 = vcmp.ge.f32.partialorder %v139_v1, 0.0  ;;  %v141_v3 = vld [vmem:[%s712_s30 + $0x18] sm:$0xff]  ;;  %v142_v4 = vld [vmem:[%s712_s30 + $0x20] sm:$0xff]  ;;  %s814_s2 = scalar_lea.hbm %s872_s1, %s437_s25  ;;  %s818_s17 = int_to_ptr.vmem [resolvable:$true] %s313_s17 }
  0x3a   : > { %vm172_vm2 = vcmp.ge.f32.partialorder %v140_v2, 0.0  ;;  %v143_v5 = vld [vmem:[%s712_s30 + $0x28] sm:$0xff]  ;;  %v396_v7 = vsel %vm170_vm0, 1.0, %v590_v6  ;;  %v397_v8 = vsel %vm171_vm1, 1.0, %v590_v6  ;;  %vm173_vm3 = vcmp.ge.f32.partialorder %v141_v3, 0.0  ;;  %v144_v10 = vld [vmem:[%s712_s30 + $0x30] sm:$0xff] }
  0x3b   : > { %v398_v9 = vsel %vm172_vm2, 1.0, %v590_v6  ;;  %v145_v11 = vld [vmem:[%s712_s30 + $0x38] sm:$0xff]  ;;  %266 = vst [vmem:[%s722_s27] sm:$0xff] %v396_v7  ;;  %267 = vst [vmem:[%s722_s27 + $0x8] sm:$0xff] %v397_v8  ;;  %v399_v12 = vsel %vm173_vm3, 1.0, %v590_v6  ;;  %vm174_vm4 = vcmp.ge.f32.partialorder %v142_v4, 0.0  ;;  %vm175_vm5 = vcmp.ge.f32.partialorder %v143_v5, 0.0 }
  0x3c   : > { %268 = vst [vmem:[%s722_s27 + $0x10] sm:$0xff] %v398_v9  ;;  %vm176_vm6 = vcmp.ge.f32.partialorder %v144_v10, 0.0  ;;  %v146_v13 = vld [vmem:[%s712_s30 + $0x40] sm:$0xff]  ;;  %v147_v14 = vld [vmem:[%s712_s30 + $0x48] sm:$0xff]  ;;  %269 = vst [vmem:[%s722_s27 + $0x18] sm:$0xff] %v399_v12  ;;  %v400_v15 = vsel %vm174_vm4, 1.0, %v590_v6 }
  0x3d   : > { %v401_v16 = vsel %vm175_vm5, 1.0, %v590_v6  ;;  %v402_v17 = vsel %vm176_vm6, 1.0, %v590_v6  ;;  %vm177_vm7 = vcmp.ge.f32.partialorder %v145_v11, 0.0  ;;  %v148_v18 = vld [vmem:[%s712_s30 + $0x50] sm:$0xff]  ;;  %v149_v19 = vld [vmem:[%s712_s30 + $0x58] sm:$0xff]  ;;  %270 = vst [vmem:[%s722_s27 + $0x20] sm:$0xff] %v400_v15 }
  0x3e   : > { %271 = vst [vmem:[%s722_s27 + $0x28] sm:$0xff] %v401_v16  ;;  %272 = vst [vmem:[%s722_s27 + $0x30] sm:$0xff] %v402_v17  ;;  %v403_v20 = vsel %vm177_vm7, 1.0, %v590_v6  ;;  %vm178_vm8 = vcmp.ge.f32.partialorder %v146_v13, 0.0  ;;  %vm179_vm9 = vcmp.ge.f32.partialorder %v147_v14, 0.0  ;;  %vm180_vm10 = vcmp.ge.f32.partialorder %v148_v18, 0.0 }
  0x3f   : > { %v150_v21 = vld [vmem:[%s712_s30 + $0x60] sm:$0xff]  ;;  %v151_v22 = vld [vmem:[%s712_s30 + $0x68] sm:$0xff]  ;;  %273 = vst [vmem:[%s722_s27 + $0x38] sm:$0xff] %v403_v20  ;;  %v404_v23 = vsel %vm178_vm8, 1.0, %v590_v6  ;;  %v405_v24 = vsel %vm179_vm9, 1.0, %v590_v6  ;;  %v406_v25 = vsel %vm180_vm10, 1.0, %v590_v6 }
  0x40   : > { %vm181_vm11 = vcmp.ge.f32.partialorder %v149_v19, 0.0  ;;  %v152_v26 = vld [vmem:[%s712_s30 + $0x70] sm:$0xff]  ;;  %v153_v27 = vld [vmem:[%s712_s30 + $0x78] sm:$0xff]  ;;  %274 = vst [vmem:[%s722_s27 + $0x40] sm:$0xff] %v404_v23  ;;  %275 = vst [vmem:[%s722_s27 + $0x48] sm:$0xff] %v405_v24  ;;  %vm182_vm12 = vcmp.ge.f32.partialorder %v150_v21, 0.0 }
  0x41   : > { %276 = vst [vmem:[%s722_s27 + $0x50] sm:$0xff] %v406_v25  ;;  %v407_v28 = vsel %vm181_vm11, 1.0, %v590_v6  ;;  %vm183_vm13 = vcmp.ge.f32.partialorder %v151_v22, 0.0  ;;  %vm184_vm14 = vcmp.ge.f32.partialorder %v152_v26, 0.0  ;;  %v154_v29 = vld [vmem:[%s712_s30 + $0x80] sm:$0xff]  ;;  %v155_v30 = vld [vmem:[%s712_s30 + $0x88] sm:$0xff] }
  0x42   : > { %277 = vst [vmem:[%s722_s27 + $0x58] sm:$0xff] %v407_v28  ;;  %v408_v31 = vsel %vm182_vm12, 1.0, %v590_v6  ;;  %v409_v32 = vsel %vm183_vm13, 1.0, %v590_v6  ;;  %v410_v33 = vsel %vm184_vm14, 1.0, %v590_v6  ;;  %vm185_vm15 = vcmp.ge.f32.partialorder %v153_v27, 0.0  ;;  %v156_v34 = vld [vmem:[%s712_s30 + $0x90] sm:$0xff] }
  0x43   : > { %v157_v35 = vld [vmem:[%s712_s30 + $0x98] sm:$0xff]  ;;  %278 = vst [vmem:[%s722_s27 + $0x60] sm:$0xff] %v408_v31  ;;  %279 = vst [vmem:[%s722_s27 + $0x68] sm:$0xff] %v409_v32  ;;  %v411_v36 = vsel %vm185_vm15, 1.0, %v590_v6  ;;  %vm186_vm0 = vcmp.ge.f32.partialorder %v154_v29, 0.0  ;;  %vm187_vm1 = vcmp.ge.f32.partialorder %v155_v30, 0.0 }
  0x44   : > { %280 = vst [vmem:[%s722_s27 + $0x70] sm:$0xff] %v410_v33  ;;  %vm188_vm2 = vcmp.ge.f32.partialorder %v156_v34, 0.0  ;;  %v158_v37 = vld [vmem:[%s712_s30 + $0xa0] sm:$0xff]  ;;  %v159_v38 = vld [vmem:[%s712_s30 + $0xa8] sm:$0xff]  ;;  %281 = vst [vmem:[%s722_s27 + $0x78] sm:$0xff] %v411_v36  ;;  %v412_v39 = vsel %vm186_vm0, 1.0, %v590_v6 }
  0x45   : > { %v413_v40 = vsel %vm187_vm1, 1.0, %v590_v6  ;;  %v414_v41 = vsel %vm188_vm2, 1.0, %v590_v6  ;;  %vm189_vm3 = vcmp.ge.f32.partialorder %v157_v35, 0.0  ;;  %v160_v42 = vld [vmem:[%s712_s30 + $0xb0] sm:$0xff]  ;;  %v161_v43 = vld [vmem:[%s712_s30 + $0xb8] sm:$0xff]  ;;  %282 = vst [vmem:[%s722_s27 + $0x80] sm:$0xff] %v412_v39 }
  0x46   : > { %283 = vst [vmem:[%s722_s27 + $0x88] sm:$0xff] %v413_v40  ;;  %284 = vst [vmem:[%s722_s27 + $0x90] sm:$0xff] %v414_v41  ;;  %v415_v44 = vsel %vm189_vm3, 1.0, %v590_v6  ;;  %vm190_vm4 = vcmp.ge.f32.partialorder %v158_v37, 0.0  ;;  %vm191_vm5 = vcmp.ge.f32.partialorder %v159_v38, 0.0  ;;  %vm192_vm6 = vcmp.ge.f32.partialorder %v160_v42, 0.0 }
  0x47   : > { %v162_v45 = vld [vmem:[%s712_s30 + $0xc0] sm:$0xff]  ;;  %v163_v46 = vld [vmem:[%s712_s30 + $0xc8] sm:$0xff]  ;;  %285 = vst [vmem:[%s722_s27 + $0x98] sm:$0xff] %v415_v44  ;;  %v416_v47 = vsel %vm190_vm4, 1.0, %v590_v6  ;;  %v417_v48 = vsel %vm191_vm5, 1.0, %v590_v6  ;;  %v418_v49 = vsel %vm192_vm6, 1.0, %v590_v6 }
  0x48   : > { %vm193_vm7 = vcmp.ge.f32.partialorder %v161_v43, 0.0  ;;  %v164_v50 = vld [vmem:[%s712_s30 + $0xd0] sm:$0xff]  ;;  %v165_v51 = vld [vmem:[%s712_s30 + $0xd8] sm:$0xff]  ;;  %286 = vst [vmem:[%s722_s27 + $0xa0] sm:$0xff] %v416_v47  ;;  %287 = vst [vmem:[%s722_s27 + $0xa8] sm:$0xff] %v417_v48  ;;  %vm194_vm8 = vcmp.ge.f32.partialorder %v162_v45, 0.0 }
  0x49   : > { %288 = vst [vmem:[%s722_s27 + $0xb0] sm:$0xff] %v418_v49  ;;  %v419_v52 = vsel %vm193_vm7, 1.0, %v590_v6  ;;  %vm195_vm9 = vcmp.ge.f32.partialorder %v163_v46, 0.0  ;;  %vm196_vm10 = vcmp.ge.f32.partialorder %v164_v50, 0.0  ;;  %v166_v53 = vld [vmem:[%s712_s30 + $0xe0] sm:$0xff]  ;;  %v167_v54 = vld [vmem:[%s712_s30 + $0xe8] sm:$0xff] }
  0x4a   : > { %289 = vst [vmem:[%s722_s27 + $0xb8] sm:$0xff] %v419_v52  ;;  %v420_v55 = vsel %vm194_vm8, 1.0, %v590_v6  ;;  %v421_v56 = vsel %vm195_vm9, 1.0, %v590_v6  ;;  %v422_v57 = vsel %vm196_vm10, 1.0, %v590_v6  ;;  %vm197_vm11 = vcmp.ge.f32.partialorder %v165_v51, 0.0  ;;  %v168_v58 = vld [vmem:[%s712_s30 + $0xf0] sm:$0xff] }
  0x4b   : > { %v169_v59 = vld [vmem:[%s712_s30 + $0xf8] sm:$0xff]  ;;  %290 = vst [vmem:[%s722_s27 + $0xc0] sm:$0xff] %v420_v55  ;;  %291 = vst [vmem:[%s722_s27 + $0xc8] sm:$0xff] %v421_v56  ;;  %v423_v60 = vsel %vm197_vm11, 1.0, %v590_v6  ;;  %vm198_vm12 = vcmp.ge.f32.partialorder %v166_v53, 0.0  ;;  %vm199_vm13 = vcmp.ge.f32.partialorder %v167_v54, 0.0 }
  0x4c   : > { %292 = vst [vmem:[%s722_s27 + $0xd0] sm:$0xff] %v422_v57  ;;  %vm200_vm14 = vcmp.ge.f32.partialorder %v168_v58, 0.0  ;;  %293 = vst [vmem:[%s722_s27 + $0xd8] sm:$0xff] %v423_v60  ;;  %v424_v61 = vsel %vm198_vm12, 1.0, %v590_v6  ;;  %v425_v62 = vsel %vm199_vm13, 1.0, %v590_v6  ;;  %vm201_vm15 = vcmp.ge.f32.partialorder %v169_v59, 0.0 }
  0x4d   : > { %v426_v63 = vsel %vm200_vm14, 1.0, %v590_v6  ;;  %294 = vst [vmem:[%s722_s27 + $0xe0] sm:$0xff] %v424_v61  ;;  %295 = vst [vmem:[%s722_s27 + $0xe8] sm:$0xff] %v425_v62  ;;  %v427_v0 = vsel %vm201_vm15, 1.0, %v590_v6  ;;  %s299_s10 = scalar_lea.sflag [#allocation4], %s708_s23  ;;  %s519_s3 = scalar_lea.vmem %s818_s17, 4096 }
  0x4e   : > { %296 = vst [vmem:[%s722_s27 + $0xf0] sm:$0xff] %v426_v63  ;;  %297 = vst [vmem:[%s722_s27 + $0xf8] sm:$0xff] %v427_v0  ;;  %p520_p6 = scmp.ne.s32.totalorder %s818_s17, %s519_s3  ;;  %p879_p11 = scmp.ne.s32.totalorder %s876_s18, 0 }
  0x4f   : > { %s591_s4 = smov [#allocation5]  }
  0x50   : > { %p521_p12 = pnand %p520_p6, %p879_p11  ;;  %s523_s5 = sshll.u32 %s591_s4, 4  ;;  %s524_s5 = int_to_ptr.vmem [resolvable:$false] %s523_s5 }
  0x51   : > { %s525_s11 = scalar_lea.vmem %s524_s5, 8192  ;;  %p526_p8 = scmp.lt.s32.totalorder %s818_s17, %s524_s5 }
  0x52   : > { %p522_p13 = pneg %p521_p12  ;;  %p527_p10 = scmp.lt.s32.totalorder %s525_s11, %s519_s3 }
  0x54   : > { %p528_p0 = por %p527_p10, %p526_p8 }
  0x56   : > { %p529_p2 = pnand %p528_p0, %p522_p13 }
  0x58   : > { %532 = shalt.err (!%p529_p2)
}
  0x59   : > { %s533_s13 = scalar_lea.hbm %s814_s2, 4096  ;;  %s537_s20 = scalar_lea.hbm %s872_s1, 8192 }
  0x5a   : > { %p534_p4 = scmp.ne.s32.totalorder %s814_s2, %s533_s13  ;;  %p538_p9 = scmp.lt.u32.totalorder %s814_s2, %s872_s1 }
  0x5b   : > { %p539_p1 = scmp.lt.u32.totalorder %s537_s20, %s533_s13  ;;  %p541_p6 = scmp.lt.u32.totalorder %s533_s13, %s814_s2 }
  0x5c   : > { %p535_p5 = pnand %p534_p4, %p879_p11 }
  0x5d   : > { %p540_p3 = por %p539_p1, %p538_p9 }
  0x5e   : > { %p536_p7 = pneg %p535_p5 }
  0x5f   : > { %p542_p12 = por %p541_p6, %p540_p3 }
  0x61   : > { %p543_p13 = pnand %p542_p12, %p536_p7 }
  0x63   : > { %546 = shalt.err (!%p543_p13)
}
  0x64   : > { %s592_s24 = smov 2048   ;;  %s593_s26 = smov 128  }
  0x65   : > { %440 = dma.vmem_to_hbm [thread:$0]  (%p879_p11), %s818_s17, 4096, %s814_s2, %s299_s10, %s592_s24, %s592_s24, %s593_s26  }
  0x66 PF: > { %s328_s30 = sand.u32 1, %s573_s6   ;;  %p880_p8 = scmp.ne.s32.totalorder %s877_s19, 0 }
  0x67   : > { %p881_p10 = scmp.ge.s32.totalorder %s585_s9, 2  ;;  %s329_s25 = scalar_lea.sflag [#allocation4], %s328_s30 }
  0x69   : > { %p447_p0 = pnand %p881_p10, %p880_p8 }
  0x6b   : > { %568 = dma.done.wait (!%p447_p0), %s329_s25, 4096  }
  0x6c   : > { %570 = vsyncadd (!%p447_p0), %s329_s25, 4294963200  ;;  %p14_p2 = scmp.ge.s32.totalorder %s629_s12, 4   ;;  %s882_s6 = smov %s577_s7 }
  0x6d   : > { %s883_s7 = smov %s581_s8  ;;  %s884_s8 = smov %s641_s15 }
  0x6e   : > { %s885_s9 = smov %s629_s12  ;;  %16 = sbr.rel (!%p14_p2) target bundleno = 5 (0x5), region = 69 }
  0x75   :  { %334 = vsyncpa [#allocation3], 1 }
  0x76   :  { %336 = vsyncpa [#allocation3 + $0x1], 1 }
  0x77   :  { %337 = vsyncpa [#allocation4], 1 }
  0x78   :  { %339 = vsyncpa [#allocation4 + $0x1], 1 }

</bundles_post_ra>
